<compile_context>
chip_gen: v6e
topology: v6e:2x2x1
jax: 0.10.0
libtpu: 0.0.40
codegen_flags: <defaults>
</compile_context>

<pallas_src>
import math
import functools

import jax
import jax.numpy as jnp
from jax import lax
from jax.experimental import pallas as pl
from jax.experimental.pallas import tpu as pltpu


def self_attention_kernel(x_ref, wq_ref, wk_ref, wv_ref,
                          bq_ref, bk_ref, bv_ref, o_ref,
                          *, num_heads, head_size):
    # One grid step == one batch element; refs are (S, D) / (D, A) / (1, A) / (S, A).
    x = x_ref[...]
    in_dtype = x.dtype
    scale = 1.0 / math.sqrt(head_size)

    # Q/K/V projections on the MXU, f32 accumulation, bias add in f32.
    q = jnp.dot(x, wq_ref[...], preferred_element_type=jnp.float32) + bq_ref[...]
    k = jnp.dot(x, wk_ref[...], preferred_element_type=jnp.float32) + bk_ref[...]
    v = jnp.dot(x, wv_ref[...], preferred_element_type=jnp.float32) + bv_ref[...]

    # Fold the softmax scale into q: S*A VPU ops instead of S*S per head.
    q = q * scale

    # MXU inputs stay in the model dtype (no f32 up-promotion of q/k/v values);
    # accumulation remains f32 via preferred_element_type.  For f32 models the
    # casts are no-ops.
    q = q.astype(in_dtype)
    k = k.astype(in_dtype)
    v = v.astype(in_dtype)

    # Static per-head loop (num_heads is a compile-time constant, fully unrolled).
    head_outs = []
    for h in range(num_heads):
        sl = slice(h * head_size, (h + 1) * head_size)
        qh, kh, vh = q[:, sl], k[:, sl], v[:, sl]

        # QK^T as a last-dim/last-dim contraction — feeds the MXU directly,
        # no XLU transpose / VMEM copy of kh.
        scores = lax.dot_general(
            qh, kh,
            dimension_numbers=(((1,), (1,)), ((), ())),
            preferred_element_type=jnp.float32)                  # (S, S) f32

        # Max-subtracted softmax; keep elementwise math in f32.  The 1/denominator
        # is applied to the (S, hd) context instead of the (S, S) numerator.
        m = jnp.max(scores, axis=-1, keepdims=True)              # XLU
        e = jnp.exp(scores - m)                                  # EUP
        l = jnp.sum(e, axis=-1, keepdims=True)                   # XLU

        # TODO(synk): the `relax=True` branch draws torch.randn at forward time
        # (non-deterministic); only the relax=False path is implemented here.

        ctx = jnp.dot(e.astype(in_dtype), vh,
                      preferred_element_type=jnp.float32)        # (S, hd) f32
        # Exact reciprocal (tolerance-critical); cast per head so the concat
        # below moves half-width data for bf16 models.
        head_outs.append((ctx * pl.reciprocal(l)).astype(o_ref.dtype))

    # Single lane-dense (S, A) store instead of num_heads masked partial stores.
    o_ref[...] = jnp.concatenate(head_outs, axis=-1)


def self_attention(x, wq, wk, wv, bq, bk, bv, num_heads):
    """x: (B, S, D); w*: (D, A); b*: (1, A). Returns (B, S, A)."""
    B, S, D = x.shape
    A = wq.shape[1]
    head_size = A // num_heads

    kernel = functools.partial(
        self_attention_kernel, num_heads=num_heads, head_size=head_size)

    itemsize = jnp.dtype(x.dtype).itemsize
    cost = pl.CostEstimate(
        # 3 projections + (QK^T and PV) per head.
        flops=6 * B * S * D * A + 4 * B * S * S * A,
        transcendentals=B * num_heads * S * S,                   # exp
        bytes_accessed=(B * S * D + 3 * D * A + 3 * A + B * S * A) * itemsize,
    )

    return pl.pallas_call(
        kernel,
        out_shape=jax.ShapeDtypeStruct((B, S, A), x.dtype),
        grid_spec=pltpu.PrefetchScalarGridSpec(
            num_scalar_prefetch=0,
            grid=(B,),
            in_specs=[
                pl.BlockSpec((None, S, D), lambda b: (b, 0, 0)),  # x   -> (S, D)
                pl.BlockSpec((D, A), lambda b: (0, 0)),           # Wq  (resident)
                pl.BlockSpec((D, A), lambda b: (0, 0)),           # Wk
                pl.BlockSpec((D, A), lambda b: (0, 0)),           # Wv
                pl.BlockSpec((1, A), lambda b: (0, 0)),           # bq
                pl.BlockSpec((1, A), lambda b: (0, 0)),           # bk
                pl.BlockSpec((1, A), lambda b: (0, 0)),           # bv
            ],
            out_specs=pl.BlockSpec((None, S, A), lambda b: (b, 0, 0)),  # -> (S, A)
        ),
        compiler_params=pltpu.CompilerParams(
            dimension_semantics=("parallel",),
            vmem_limit_bytes=64 * 1024 * 1024),
        cost_estimate=cost,
    )(x, wq, wk, wv, bq, bk, bv)


def self_attention_reference(x, wq, wk, wv, bq, bk, bv, num_heads):
    """Pure-JAX mirror of the torch forward (relax=False)."""
    B, S, D = x.shape
    A = wq.shape[1]
    hd = A // num_heads
    q = x @ wq + bq
    k = x @ wk + bk
    v = x @ wv + bv

    def split(t):
        return t.reshape(B, S, num_heads, hd).transpose(0, 2, 1, 3)   # (B, H, S, hd)

    q, k, v = split(q), split(k), split(v)
    scores = jnp.einsum("bhqd,bhkd->bhqk", q, k) / math.sqrt(hd)
    probs = jax.nn.softmax(scores, axis=-1)
    out = jnp.einsum("bhqk,bhkd->bhqd", probs, v)
    out = out.transpose(0, 2, 1, 3).reshape(B, S, D)
    return out


if __name__ == "__main__":
    # hidden_size == all_head_size (required by the module's final reshape).
    B, S, D, H = 2, 8, 32, 4
    A = D

    key = jax.random.PRNGKey(0)
    kx, kq, kk, kv, kbq, kbk, kbv = jax.random.split(key, 7)

    x = jax.random.normal(kx, (B, S, D), dtype=jnp.float32)

    # Deterministic nn.Linear-style init: U(-1/sqrt(fan_in), 1/sqrt(fan_in)).
    bound = 1.0 / math.sqrt(D)
    wq = jax.random.uniform(kq, (D, A), jnp.float32, -bound, bound)
    wk = jax.random.uniform(kk, (D, A), jnp.float32, -bound, bound)
    wv = jax.random.uniform(kv, (D, A), jnp.float32, -bound, bound)
    bq = jax.random.uniform(kbq, (1, A), jnp.float32, -bound, bound)
    bk = jax.random.uniform(kbk, (1, A), jnp.float32, -bound, bound)
    bv = jax.random.uniform(kbv, (1, A), jnp.float32, -bound, bound)

    out = self_attention(x, wq, wk, wv, bq, bk, bv, H)
    out = jax.block_until_ready(out)

    ref = self_attention_reference(x, wq, wk, wv, bq[0], bk[0], bv[0], H)
    assert out.shape == (B, S, D)
    assert jnp.allclose(out, ref, atol=1e-5, rtol=1e-5), "mismatch vs reference"

    print("KERNEL_OK")
</pallas_src>

<mosaic_0001>
module attributes {stable_mosaic.version = 11 : i64} {
  func.func @self_attention_kernel(%arg0: i32, %arg1: memref<1x8x32xf32, #tpu.memory_space<vmem>>, %arg2: memref<32x32xf32, #tpu.memory_space<vmem>>, %arg3: memref<32x32xf32, #tpu.memory_space<vmem>>, %arg4: memref<32x32xf32, #tpu.memory_space<vmem>>, %arg5: memref<1x32xf32, #tpu.memory_space<vmem>>, %arg6: memref<1x32xf32, #tpu.memory_space<vmem>>, %arg7: memref<1x32xf32, #tpu.memory_space<vmem>>, %arg8: memref<1x8x32xf32, #tpu.memory_space<vmem>>) attributes {dimension_semantics = [#tpu.dimension_semantics<parallel>], iteration_bounds = array<i64: 2>, scalar_prefetch = 0 : i64, scratch_operands = 0 : i64, tpu.core_type = #tpu.core_type<tc>, window_params = [{transform_indices = @transform_0, window_bounds = array<i64: 1, 8, 32>}, {pipeline_mode = #tpu.pipeline_mode<synchronous>, transform_indices = @transform_1, window_bounds = array<i64: 32, 32>}, {pipeline_mode = #tpu.pipeline_mode<synchronous>, transform_indices = @transform_2, window_bounds = array<i64: 32, 32>}, {pipeline_mode = #tpu.pipeline_mode<synchronous>, transform_indices = @transform_3, window_bounds = array<i64: 32, 32>}, {pipeline_mode = #tpu.pipeline_mode<synchronous>, transform_indices = @transform_4, window_bounds = array<i64: 1, 32>}, {pipeline_mode = #tpu.pipeline_mode<synchronous>, transform_indices = @transform_5, window_bounds = array<i64: 1, 32>}, {pipeline_mode = #tpu.pipeline_mode<synchronous>, transform_indices = @transform_6, window_bounds = array<i64: 1, 32>}, {transform_indices = @transform_7, window_bounds = array<i64: 1, 8, 32>}]} {
    %c0 = arith.constant 0 : index
    %c0_0 = arith.constant 0 : index
    %c0_1 = arith.constant 0 : index
    %0 = vector.load %arg1[%c0, %c0_0, %c0_1] : memref<1x8x32xf32, #tpu.memory_space<vmem>>, vector<1x8x32xf32>
    %1 = vector.shape_cast %0 : vector<1x8x32xf32> to vector<8x32xf32>
    %c0_2 = arith.constant 0 : index
    %c0_3 = arith.constant 0 : index
    %2 = vector.load %arg2[%c0_2, %c0_3] : memref<32x32xf32, #tpu.memory_space<vmem>>, vector<32x32xf32>
    %cst = arith.constant dense<0.000000e+00> : vector<8x32xf32>
    %3 = tpu.matmul %1, %2, %cst {dimension_numbers = #tpu.dot_dimension_numbers<[1], [0], [0], [1], [0, 0, 1, 1], [], []>} : vector<8x32xf32>, vector<32x32xf32>, vector<8x32xf32> -> vector<8x32xf32>
    %c0_4 = arith.constant 0 : index
    %c0_5 = arith.constant 0 : index
    %4 = vector.load %arg5[%c0_4, %c0_5] : memref<1x32xf32, #tpu.memory_space<vmem>>, vector<1x32xf32>
    %5 = vector.broadcast %4 : vector<1x32xf32> to vector<8x32xf32>
    %6 = arith.addf %3, %5 : vector<8x32xf32>
    %c0_6 = arith.constant 0 : index
    %c0_7 = arith.constant 0 : index
    %7 = vector.load %arg3[%c0_6, %c0_7] : memref<32x32xf32, #tpu.memory_space<vmem>>, vector<32x32xf32>
    %cst_8 = arith.constant dense<0.000000e+00> : vector<8x32xf32>
    %8 = tpu.matmul %1, %7, %cst_8 {dimension_numbers = #tpu.dot_dimension_numbers<[1], [0], [0], [1], [0, 0, 1, 1], [], []>} : vector<8x32xf32>, vector<32x32xf32>, vector<8x32xf32> -> vector<8x32xf32>
    %c0_9 = arith.constant 0 : index
    %c0_10 = arith.constant 0 : index
    %9 = vector.load %arg6[%c0_9, %c0_10] : memref<1x32xf32, #tpu.memory_space<vmem>>, vector<1x32xf32>
    %10 = vector.broadcast %9 : vector<1x32xf32> to vector<8x32xf32>
    %11 = arith.addf %8, %10 : vector<8x32xf32>
    %c0_11 = arith.constant 0 : index
    %c0_12 = arith.constant 0 : index
    %12 = vector.load %arg4[%c0_11, %c0_12] : memref<32x32xf32, #tpu.memory_space<vmem>>, vector<32x32xf32>
    %cst_13 = arith.constant dense<0.000000e+00> : vector<8x32xf32>
    %13 = tpu.matmul %1, %12, %cst_13 {dimension_numbers = #tpu.dot_dimension_numbers<[1], [0], [0], [1], [0, 0, 1, 1], [], []>} : vector<8x32xf32>, vector<32x32xf32>, vector<8x32xf32> -> vector<8x32xf32>
    %c0_14 = arith.constant 0 : index
    %c0_15 = arith.constant 0 : index
    %14 = vector.load %arg7[%c0_14, %c0_15] : memref<1x32xf32, #tpu.memory_space<vmem>>, vector<1x32xf32>
    %15 = vector.broadcast %14 : vector<1x32xf32> to vector<8x32xf32>
    %16 = arith.addf %13, %15 : vector<8x32xf32>
    %cst_16 = arith.constant 0.353553385 : f32
    %17 = vector.broadcast %cst_16 : f32 to vector<8x32xf32>
    %18 = arith.mulf %6, %17 : vector<8x32xf32>
    %19 = vector.extract_strided_slice %18 {offsets = [0, 0], sizes = [8, 8], strides = [1, 1]} : vector<8x32xf32> to vector<8x8xf32>
    %20 = vector.extract_strided_slice %11 {offsets = [0, 0], sizes = [8, 8], strides = [1, 1]} : vector<8x32xf32> to vector<8x8xf32>
    %21 = vector.extract_strided_slice %16 {offsets = [0, 0], sizes = [8, 8], strides = [1, 1]} : vector<8x32xf32> to vector<8x8xf32>
    %cst_17 = arith.constant dense<0.000000e+00> : vector<8x8xf32>
    %22 = tpu.matmul %19, %20, %cst_17 {dimension_numbers = #tpu.dot_dimension_numbers<[1], [1], [0], [0], [0, 0, 1, 0], [], []>} : vector<8x8xf32>, vector<8x8xf32>, vector<8x8xf32> -> vector<8x8xf32>
    %cst_18 = arith.constant dense<0xFF800000> : vector<8xf32>
    %23 = vector.multi_reduction <maximumf>, %22, %cst_18 [1] : vector<8x8xf32> to vector<8xf32>
    %24 = vector.shape_cast %23 : vector<8xf32> to vector<8x1xf32>
    %25 = vector.broadcast %24 : vector<8x1xf32> to vector<8x8xf32>
    %26 = arith.subf %22, %25 : vector<8x8xf32>
    %27 = math.exp %26 : vector<8x8xf32>
    %cst_19 = arith.constant dense<0.000000e+00> : vector<8xf32>
    %28 = vector.multi_reduction <add>, %27, %cst_19 [1] : vector<8x8xf32> to vector<8xf32>
    %29 = vector.shape_cast %28 : vector<8xf32> to vector<8x1xf32>
    %cst_20 = arith.constant dense<0.000000e+00> : vector<8x8xf32>
    %30 = tpu.matmul %27, %21, %cst_20 {dimension_numbers = #tpu.dot_dimension_numbers<[1], [0], [0], [1], [0, 0, 1, 1], [], []>} : vector<8x8xf32>, vector<8x8xf32>, vector<8x8xf32> -> vector<8x8xf32>
    %31 = tpu.reciprocal %29 : vector<8x1xf32> -> vector<8x1xf32>
    %32 = vector.broadcast %31 : vector<8x1xf32> to vector<8x8xf32>
    %33 = arith.mulf %30, %32 : vector<8x8xf32>
    %34 = vector.extract_strided_slice %18 {offsets = [0, 8], sizes = [8, 8], strides = [1, 1]} : vector<8x32xf32> to vector<8x8xf32>
    %35 = vector.extract_strided_slice %11 {offsets = [0, 8], sizes = [8, 8], strides = [1, 1]} : vector<8x32xf32> to vector<8x8xf32>
    %36 = vector.extract_strided_slice %16 {offsets = [0, 8], sizes = [8, 8], strides = [1, 1]} : vector<8x32xf32> to vector<8x8xf32>
    %cst_21 = arith.constant dense<0.000000e+00> : vector<8x8xf32>
    %37 = tpu.matmul %34, %35, %cst_21 {dimension_numbers = #tpu.dot_dimension_numbers<[1], [1], [0], [0], [0, 0, 1, 0], [], []>} : vector<8x8xf32>, vector<8x8xf32>, vector<8x8xf32> -> vector<8x8xf32>
    %cst_22 = arith.constant dense<0xFF800000> : vector<8xf32>
    %38 = vector.multi_reduction <maximumf>, %37, %cst_22 [1] : vector<8x8xf32> to vector<8xf32>
    %39 = vector.shape_cast %38 : vector<8xf32> to vector<8x1xf32>
    %40 = vector.broadcast %39 : vector<8x1xf32> to vector<8x8xf32>
    %41 = arith.subf %37, %40 : vector<8x8xf32>
    %42 = math.exp %41 : vector<8x8xf32>
    %cst_23 = arith.constant dense<0.000000e+00> : vector<8xf32>
    %43 = vector.multi_reduction <add>, %42, %cst_23 [1] : vector<8x8xf32> to vector<8xf32>
    %44 = vector.shape_cast %43 : vector<8xf32> to vector<8x1xf32>
    %cst_24 = arith.constant dense<0.000000e+00> : vector<8x8xf32>
    %45 = tpu.matmul %42, %36, %cst_24 {dimension_numbers = #tpu.dot_dimension_numbers<[1], [0], [0], [1], [0, 0, 1, 1], [], []>} : vector<8x8xf32>, vector<8x8xf32>, vector<8x8xf32> -> vector<8x8xf32>
    %46 = tpu.reciprocal %44 : vector<8x1xf32> -> vector<8x1xf32>
    %47 = vector.broadcast %46 : vector<8x1xf32> to vector<8x8xf32>
    %48 = arith.mulf %45, %47 : vector<8x8xf32>
    %49 = vector.extract_strided_slice %18 {offsets = [0, 16], sizes = [8, 8], strides = [1, 1]} : vector<8x32xf32> to vector<8x8xf32>
    %50 = vector.extract_strided_slice %11 {offsets = [0, 16], sizes = [8, 8], strides = [1, 1]} : vector<8x32xf32> to vector<8x8xf32>
    %51 = vector.extract_strided_slice %16 {offsets = [0, 16], sizes = [8, 8], strides = [1, 1]} : vector<8x32xf32> to vector<8x8xf32>
    %cst_25 = arith.constant dense<0.000000e+00> : vector<8x8xf32>
    %52 = tpu.matmul %49, %50, %cst_25 {dimension_numbers = #tpu.dot_dimension_numbers<[1], [1], [0], [0], [0, 0, 1, 0], [], []>} : vector<8x8xf32>, vector<8x8xf32>, vector<8x8xf32> -> vector<8x8xf32>
    %cst_26 = arith.constant dense<0xFF800000> : vector<8xf32>
    %53 = vector.multi_reduction <maximumf>, %52, %cst_26 [1] : vector<8x8xf32> to vector<8xf32>
    %54 = vector.shape_cast %53 : vector<8xf32> to vector<8x1xf32>
    %55 = vector.broadcast %54 : vector<8x1xf32> to vector<8x8xf32>
    %56 = arith.subf %52, %55 : vector<8x8xf32>
    %57 = math.exp %56 : vector<8x8xf32>
    %cst_27 = arith.constant dense<0.000000e+00> : vector<8xf32>
    %58 = vector.multi_reduction <add>, %57, %cst_27 [1] : vector<8x8xf32> to vector<8xf32>
    %59 = vector.shape_cast %58 : vector<8xf32> to vector<8x1xf32>
    %cst_28 = arith.constant dense<0.000000e+00> : vector<8x8xf32>
    %60 = tpu.matmul %57, %51, %cst_28 {dimension_numbers = #tpu.dot_dimension_numbers<[1], [0], [0], [1], [0, 0, 1, 1], [], []>} : vector<8x8xf32>, vector<8x8xf32>, vector<8x8xf32> -> vector<8x8xf32>
    %61 = tpu.reciprocal %59 : vector<8x1xf32> -> vector<8x1xf32>
    %62 = vector.broadcast %61 : vector<8x1xf32> to vector<8x8xf32>
    %63 = arith.mulf %60, %62 : vector<8x8xf32>
    %64 = vector.extract_strided_slice %18 {offsets = [0, 24], sizes = [8, 8], strides = [1, 1]} : vector<8x32xf32> to vector<8x8xf32>
    %65 = vector.extract_strided_slice %11 {offsets = [0, 24], sizes = [8, 8], strides = [1, 1]} : vector<8x32xf32> to vector<8x8xf32>
    %66 = vector.extract_strided_slice %16 {offsets = [0, 24], sizes = [8, 8], strides = [1, 1]} : vector<8x32xf32> to vector<8x8xf32>
    %cst_29 = arith.constant dense<0.000000e+00> : vector<8x8xf32>
    %67 = tpu.matmul %64, %65, %cst_29 {dimension_numbers = #tpu.dot_dimension_numbers<[1], [1], [0], [0], [0, 0, 1, 0], [], []>} : vector<8x8xf32>, vector<8x8xf32>, vector<8x8xf32> -> vector<8x8xf32>
    %cst_30 = arith.constant dense<0xFF800000> : vector<8xf32>
    %68 = vector.multi_reduction <maximumf>, %67, %cst_30 [1] : vector<8x8xf32> to vector<8xf32>
    %69 = vector.shape_cast %68 : vector<8xf32> to vector<8x1xf32>
    %70 = vector.broadcast %69 : vector<8x1xf32> to vector<8x8xf32>
    %71 = arith.subf %67, %70 : vector<8x8xf32>
    %72 = math.exp %71 : vector<8x8xf32>
    %cst_31 = arith.constant dense<0.000000e+00> : vector<8xf32>
    %73 = vector.multi_reduction <add>, %72, %cst_31 [1] : vector<8x8xf32> to vector<8xf32>
    %74 = vector.shape_cast %73 : vector<8xf32> to vector<8x1xf32>
    %cst_32 = arith.constant dense<0.000000e+00> : vector<8x8xf32>
    %75 = tpu.matmul %72, %66, %cst_32 {dimension_numbers = #tpu.dot_dimension_numbers<[1], [0], [0], [1], [0, 0, 1, 1], [], []>} : vector<8x8xf32>, vector<8x8xf32>, vector<8x8xf32> -> vector<8x8xf32>
    %76 = tpu.reciprocal %74 : vector<8x1xf32> -> vector<8x1xf32>
    %77 = vector.broadcast %76 : vector<8x1xf32> to vector<8x8xf32>
    %78 = arith.mulf %75, %77 : vector<8x8xf32>
    %79 = tpu.concatenate %33, %48, %63, %78 in 1 : vector<8x8xf32>, vector<8x8xf32>, vector<8x8xf32>, vector<8x8xf32> -> vector<8x32xf32>
    %c0_33 = arith.constant 0 : index
    %c0_34 = arith.constant 0 : index
    %c0_35 = arith.constant 0 : index
    %80 = vector.load %arg8[%c0_33, %c0_34, %c0_35] : memref<1x8x32xf32, #tpu.memory_space<vmem>>, vector<1x8x32xf32>
    %81 = vector.shape_cast %80 : vector<1x8x32xf32> to vector<8x32xf32>
    %82 = vector.shape_cast %79 : vector<8x32xf32> to vector<1x8x32xf32>
    tpu.vector_store %arg8[%c0_33, %c0_34, %c0_35], %82 {strides = array<i32>} : memref<1x8x32xf32, #tpu.memory_space<vmem>>, vector<1x8x32xf32>,
    return
  }
  func.func @transform_0(%arg0: i32) -> (i32, i32, i32) {
    %c0_i32 = arith.constant 0 : i32
    %c0_i32_0 = arith.constant 0 : i32
    %c0_i32_1 = arith.constant 0 : i32
    return %arg0, %c0_i32, %c0_i32_0 : i32, i32, i32
  }
  func.func @transform_1(%arg0: i32) -> (i32, i32) {
    %c0_i32 = arith.constant 0 : i32
    %c0_i32_0 = arith.constant 0 : i32
    %c0_i32_1 = arith.constant 0 : i32
    return %c0_i32, %c0_i32_0 : i32, i32
  }
  func.func @transform_2(%arg0: i32) -> (i32, i32) {
    %c0_i32 = arith.constant 0 : i32
    %c0_i32_0 = arith.constant 0 : i32
    %c0_i32_1 = arith.constant 0 : i32
    return %c0_i32, %c0_i32_0 : i32, i32
  }
  func.func @transform_3(%arg0: i32) -> (i32, i32) {
    %c0_i32 = arith.constant 0 : i32
    %c0_i32_0 = arith.constant 0 : i32
    %c0_i32_1 = arith.constant 0 : i32
    return %c0_i32, %c0_i32_0 : i32, i32
  }
  func.func @transform_4(%arg0: i32) -> (i32, i32) {
    %c0_i32 = arith.constant 0 : i32
    %c0_i32_0 = arith.constant 0 : i32
    %c0_i32_1 = arith.constant 0 : i32
    return %c0_i32, %c0_i32_0 : i32, i32
  }
  func.func @transform_5(%arg0: i32) -> (i32, i32) {
    %c0_i32 = arith.constant 0 : i32
    %c0_i32_0 = arith.constant 0 : i32
    %c0_i32_1 = arith.constant 0 : i32
    return %c0_i32, %c0_i32_0 : i32, i32
  }
  func.func @transform_6(%arg0: i32) -> (i32, i32) {
    %c0_i32 = arith.constant 0 : i32
    %c0_i32_0 = arith.constant 0 : i32
    %c0_i32_1 = arith.constant 0 : i32
    return %c0_i32, %c0_i32_0 : i32, i32
  }
  func.func @transform_7(%arg0: i32) -> (i32, i32, i32) {
    %c0_i32 = arith.constant 0 : i32
    %c0_i32_0 = arith.constant 0 : i32
    %c0_i32_1 = arith.constant 0 : i32
    return %arg0, %c0_i32, %c0_i32_0 : i32, i32, i32
  }
}

</mosaic_0001>

<bundles_post_ra>
// kernel: tpu_custom_call.1
= control target key start
LH: loop header
LB: loop body
LE: loop exit
PB: predicated region body
PF: predicated region fallthrough
CT: control target
= control target key end

     0   :  { %s2128_s0 = inlined_call_operand.hbm [shape: f32[2,8,32], index: 0, kind: input, shape index: {}]   ;;  %s2129_s1 = inlined_call_operand.hbm [shape: f32[32,32], index: 1, kind: input, shape index: {}]   ;;  %s2130_s2 = inlined_call_operand.hbm [shape: f32[32,32], index: 2, kind: input, shape index: {}]   ;;  %s2131_s3 = inlined_call_operand.hbm [shape: f32[32,32], index: 3, kind: input, shape index: {}]   ;;  %s2132_s4 = inlined_call_operand.vmem [shape: f32[1,32], index: 4, kind: input, shape index: {}]   ;;  %s2133_s5 = inlined_call_operand.vmem [shape: f32[1,32], index: 5, kind: input, shape index: {}]   ;;  %s2134_s6 = inlined_call_operand.vmem [shape: f32[1,32], index: 6, kind: input, shape index: {}]   ;;  %s2135_s7 = inlined_call_operand.hbm [shape: f32[2,8,32], index: 7, kind: output, shape index: {}]  }
   0x1   :  { %2140 = sst [smem:[#allocation15_spill]] %s2129_s1 }
   0x2   :  { %2141 = sst [smem:[#allocation16_spill]] %s2130_s2 }
   0x3   :  { %12 = vsyncpa [#allocation3], 0 }
   0x4   :  { %14 = vsyncpa [#allocation3 + $0x1], 0 }
   0x5   :  { %15 = vsyncpa [#allocation6], 0 }
   0x6   :  { %16 = vsyncpa [#allocation9], 0 }
   0x7   :  { %17 = vsyncpa [#allocation4], 0 }
   0x8   :  { %19 = vsyncpa [#allocation4 + $0x1], 0  ;;  %s1853_s24 = smov 0   ;;  %s1855_s25 = smov 0  }
   0x9   :  { %s1857_s26 = smov 0   ;;  %s1859_s27 = smov 0  }
   0xa LB: > { %s1874_s28 = sadd.s32 4294967295, %s1796_s27   ;;  %s1375_s29 = sadd.s32 4294967294, %s1796_s27   ;;  %s1796_s27 = sphi %s1859_s27, %s2163_s27   ;;  %s1792_s26 = sphi %s1857_s26, %s2162_s26   ;;  %s1788_s25 = sphi %s1855_s25, %s2161_s25   ;;  %s1784_s24 = sphi %s1853_s24, %s2160_s24  }
   0xb   : > { %p45_p0 = scmp.ne.s32.totalorder %s1788_s25, %s1784_s24  ;;  %p2136_p1 = scmp.eq.s32.totalorder %s1874_s28, 0 }
   0xc   : > { %p201_p3 = scmp.eq.s32.totalorder %s1375_s29, 1  ;;  %p1376_p5 = scmp.ge.s32.totalorder %s1796_s27, 1 }
   0xd   : > { %p1883_p4 = por %p2136_p1, %p45_p0  ;;  %p208_p7 = scmp.lt.s32.totalorder %s1796_s27, 3 }
   0xe   : > { %p1888_p6 = por %p201_p3, %p45_p0  ;;  %s1798_s10 = smov [#allocation5]  }
   0xf   : > { %s2142_s30 = scalar_select %p1883_p4, 1, 0 }
  0x10   : > { %s2143_s8 = scalar_select %p1888_p6, 1, 0 }
  0x11   : > { %p1893_p8 = pnand %p1376_p5, %p208_p7  ;;  %s220_s11 = sshll.u32 %s1798_s10, 4  ;;  %s221_s11 = int_to_ptr.vmem [resolvable:$true] %s220_s11 }
  0x12   : > { %s1799_s13 = smov [#allocation7]   ;;  %s1800_s15 = smov [#allocation8]  }
  0x13   : > { %s2144_s9 = scalar_select %p1893_p8, 1, 0 }
  0x14   : > { %p1531_p9 = pneg %p1893_p8  ;;  %s233_s14 = sshll.u32 %s1799_s13, 4  ;;  %s234_s14 = int_to_ptr.vmem [resolvable:$true] %s233_s14 }
  0x15   : > { %s246_s16 = sshll.u32 %s1800_s15, 4  ;;  %s1629_s17 = scalar_lea.vmem %s221_s11, 512  ;;  %s247_s16 = int_to_ptr.vmem [resolvable:$true] %s246_s16 }
  0x16   : > { %p1902_p11 = pnand %p1531_p9, %p2136_p1  ;;  %p1630_p13 = scmp.ne.s32.totalorder %s221_s11, %s1629_s17 }
  0x17   : > { %p1637_p5 = scmp.lt.s32.totalorder %s221_s11, %s221_s11  ;;  %p1638_p7 = scmp.lt.s32.totalorder %s1629_s17, %s1629_s17 }
  0x18   : > { %p1620_p12 = pneg %p1902_p11 }
  0x19   : > { %p1639_p9 = por %p1638_p7, %p1637_p5 }
  0x1a   : > { %p1632_p0 = pnand %p1630_p13, %p1620_p12 }
  0x1c   : > { %p1633_p3 = pneg %p1632_p0 }
  0x1e   : > { %p1640_p10 = pnand %p1639_p9, %p1633_p3 }
  0x20   : > { %1643 = shalt.err (!%p1640_p10)
}
  0x21   : > { %s1801_s18 = smov 128   ;;  %s1802_s19 = smov 8  }
  0x22   : > { %s2146_s1 = sld [smem:[#allocation15_spill]]  ;;  %s1655_s22 = scalar_lea.vmem %s234_s14, 512 }
  0x23   : > { %p1656_p1 = scmp.ne.s32.totalorder %s234_s14, %s1655_s22  ;;  %p1663_p2 = scmp.lt.s32.totalorder %s234_s14, %s234_s14 }
  0x24   : > { %p1664_p6 = scmp.lt.s32.totalorder %s1655_s22, %s1655_s22 }
  0x25   : > { %p1658_p13 = pnand %p1656_p1, %p1620_p12 }
  0x26   : > { %p1665_p5 = por %p1664_p6, %p1663_p2 }
  0x27   : > { %p1659_p0 = pneg %p1658_p13 }
  0x28   : > { %1534 = dma.hbm_to_vmem [thread:$0]  (!%p1902_p11), %s2146_s1, 512, %s221_s11, [#allocation6], %s1801_s18, %s1801_s18, %s1802_s19  }
  0x29   : > { %p1666_p3 = pnand %p1665_p5, %p1659_p0 }
  0x2b   : > { %1669 = shalt.err (!%p1666_p3)
}
  0x2c   : > { %s2147_s2 = sld [smem:[#allocation16_spill]]  ;;  %s1681_s10 = scalar_lea.vmem %s247_s16, 512 }
  0x2d   : > { %p1682_p10 = scmp.ne.s32.totalorder %s247_s16, %s1681_s10  ;;  %p1689_p9 = scmp.lt.s32.totalorder %s247_s16, %s247_s16 }
  0x2e   : > { %p1690_p13 = scmp.lt.s32.totalorder %s1681_s10, %s1681_s10 }
  0x2f   : > { %p1684_p7 = pnand %p1682_p10, %p1620_p12 }
  0x30   : > { %p1691_p4 = por %p1690_p13, %p1689_p9 }
  0x31   : > { %p1685_p1 = pneg %p1684_p7 }
  0x32   : > { %1537 = dma.hbm_to_vmem [thread:$0]  (!%p1902_p11), %s2147_s2, 512, %s234_s14, [#allocation6], %s1801_s18, %s1801_s18, %s1802_s19  }
  0x33   : > { %p1692_p2 = pnand %p1691_p4, %p1685_p1 }
  0x35   : > { %1695 = shalt.err (!%p1692_p2)
}
  0x36   : > { %1540 = dma.hbm_to_vmem [thread:$0]  (!%p1902_p11), %s2131_s3, 512, %s247_s16, [#allocation9], %s1801_s18, %s1801_s18, %s1802_s19  }
  0x37   : > { %s1933_s14 = sadd.s32 1, %s1796_s27   ;;  %s32_s12 = sadd.s32 1, %s1792_s26 }
  0x38   : > { %s29_s15 = ssub.s32 %s1796_s27, %s1933_s14  ;;  %p39_p6 = scmp.ne.s32.totalorder %s1792_s26, %s1788_s25 }
  0x39   : > { %p30_p4 = scmp.eq.s32.totalorder %s29_s15, 0  ;;  %p40_p12 = scmp.eq.s32.totalorder %s1796_s27, 0 }
  0x3a   : > { %p1552_p0 = scmp.lt.s32.totalorder %s1796_s27, 2  ;;  %p2148_p3 = scmp.eq.s32.totalorder %s1874_s28, 1 }
  0x3b   : > { %s1943_s17 = scalar_select %p30_p4, %s1792_s26, %s32_s12  }
  0x3c   : > { %p41_p5 = por %p40_p12, %p39_p6  ;;  %p1947_p10 = por %p2148_p3, %p39_p6 }
  0x3d   : > { %s269_s21 = sand.u32 1, %s1792_s26   ;;  %s1382_s22 = sshll.u32 %s1796_s27, 7 }
  0x3e   : > { %s2149_s20 = scalar_select %p1947_p10, 1, 0 }
  0x3f   : > { %s1381_s16 = sshll.u32 %s269_s21, 3  ;;  %s1956_s23 = scalar_lea.hbm %s2128_s0, %s1382_s22 }
  0x40   : > { %s273_s29 = scalar_lea.vmem [#allocation2], %s1381_s16  ;;  %p1958_p11 = pnand %p1552_p0, %p41_p5 }
  0x41   : > { %s280_s10 = sshll.u32 %s273_s29, 4  ;;  %s270_s13 = scalar_lea.sflag [#allocation3], %s269_s21  ;;  %s281_s10 = int_to_ptr.vmem [resolvable:$true] %s280_s10 }
  0x42   : > { %s1696_s15 = scalar_lea.hbm %s1956_s23, 128  ;;  %p1698_p1 = pneg %p1958_p11 }
  0x43   : > { %p1697_p7 = scmp.ne.s32.totalorder %s1956_s23, %s1696_s15  ;;  %s1701_s18 = scalar_lea.hbm %s2128_s0, 256 }
  0x44   : > { %p1702_p2 = scmp.lt.s32.totalorder %s1956_s23, %s2128_s0  ;;  %p1703_p4 = scmp.lt.s32.totalorder %s1701_s18, %s1696_s15 }
  0x45   : > { %p1699_p9 = pnand %p1698_p1, %p1697_p7 }
  0x46   : > { %p1704_p6 = por %p1703_p4, %p1702_p2 }
  0x47   : > { %p1700_p13 = pneg %p1699_p9 }
  0x49   : > { %p1705_p12 = pnand %p1704_p6, %p1700_p13 }
  0x4b   : > { %1708 = shalt.err (!%p1705_p12)
}
  0x4c   : > { %s1709_s29 = scalar_lea.vmem %s281_s10, 128  ;;  %s1803_s21 = smov [#allocation2]  }
  0x4d   : > { %p1710_p0 = scmp.ne.s32.totalorder %s281_s10, %s1709_s29  ;;  %s1714_s1 = sshll.u32 %s1803_s21, 4  ;;  %s1715_s1 = int_to_ptr.vmem [resolvable:$false] %s1714_s1 }
  0x4e   : > { %s1716_s2 = scalar_lea.vmem %s1715_s1, 256  ;;  %p1717_p7 = scmp.lt.s32.totalorder %s281_s10, %s1715_s1 }
  0x4f   : > { %p1712_p5 = pnand %p1710_p0, %p1698_p1  ;;  %p1718_p9 = scmp.lt.s32.totalorder %s1716_s2, %s1709_s29 }
  0x51   : > { %p1713_p3 = pneg %p1712_p5  ;;  %p1719_p10 = por %p1718_p9, %p1717_p7 }
  0x53   : > { %p1720_p8 = pnand %p1719_p10, %p1713_p3 }
  0x55   : > { %1723 = shalt.err (!%p1720_p8)
}
  0x56   : > { %1544 = dma.hbm_to_vmem [thread:$0]  (!%p1958_p11), %s1956_s23, 128, %s281_s10, %s270_s13  }
  0x57   : > { %p2151_p13 = scmp.ne.s32.totalorder %s2144_s9, 0 }
  0x58   : > { %s1979_s15 = sand.u32 (!%p2151_p13), 1, %s1788_s25   ;;  %p2152_p8 = scmp.ne.s32.totalorder (!%p2151_p13), %s2142_s30, 0 }
  0x59   : > { %289 = sbr.rel (%p2151_p13) target bundleno = 1108 (0x454), region = 48  ;;  %s1384_s12 = sshll.u32 (!%p2151_p13), %s1979_s15, 3 }
  0x5a   : > { %s292_s1 = scalar_lea.sflag (!%p2151_p13), [#allocation3], %s1979_s15  ;;  %s1985_s2 = scalar_lea.vmem (!%p2151_p13), [#allocation2], %s1384_s12 }
  0x5e   : > { %1767 = dma.done.wait (%p2152_p8), %s292_s1, 128  }
  0x5f   : > { %1769 = vsyncadd (%p2152_p8), %s292_s1, 4294967168  ;;  %p2153_p10 = scmp.eq.s32.totalorder %s1874_s28, 0 }
  0x61   : > { %1771 = dma.done.wait (%p2153_p10), [#allocation6], 1024   ;;  %p2154_p11 = pmov %p2153_p10 }
  0x62   : > { %p2155_p1 = pmov %p2153_p10 }
  0x63   : > { %1773 = vsyncadd (%p2154_p11), [#allocation6], 4294966272 }
  0x64   : > { %1775 = dma.done.wait (%p2155_p1), [#allocation9], 512   ;;  %p2156_p2 = pmov %p2155_p1 }
  0x65   : > { %v1804_v0 = vmov 0.0   ;;  %vm1805_vm0 = vmmov 0   ;;  %v342_v1 = vld [vmem:[#allocation5 + $0x18] sm:$0xff]  ;;  %v341_v3 = vld [vmem:[#allocation5 + $0x10] sm:$0xff]  ;;  %v340_v5 = vld [vmem:[#allocation5 + $0x8] sm:$0xff]  ;;  %vm350_vm1 = vcmask 261120  }
  0x66   : > { %1777 = vsyncadd (%p2156_p2), [#allocation9], 4294966784  ;;  %1442 = vmatprep.subr.mxu0 %v1804_v0  ;;  %1453 = vmatprep.subr.mxu1 %v1804_v0  ;;  %v427_v2 = vld [vmem:[#allocation7 + $0x18] sm:$0xff]  ;;  %v426_v4 = vld [vmem:[#allocation7 + $0x10] sm:$0xff]  ;;  %vm587_vm2 = vcmask 64512   ;;  %s1806_s11 = smov 112  }
  0x67   : > { %1450 = vmatprep.mubr.msk.f32.mxu0 %vm1805_vm0, %v1804_v0  ;;  %1461 = vmatprep.mubr.msk.f32.mxu1 %vm1805_vm0, %v1804_v0  ;;  %v425_v6 = vld [vmem:[#allocation7 + $0x8] sm:$0xff]  ;;  %v339_v7 = vld [vmem:[#allocation5] sm:$0xff]  ;;  %v338_v9 = vld [vmem:[%s1985_s2] sm:$0xff]  ;;  %s1807_s13 = smov 120   ;;  %s1808_s22 = smov 104   ;;  %vm1257_vm3 = vcmask 130048  }
  0x68   : > { %1443 = vmatpush3.msra.mxu0 %v342_v1  ;;  %1454 = vmatpush3.msra.mxu1 %v427_v2  ;;  %v424_v8 = vld [vmem:[#allocation7] sm:$0xff]  ;;  %v508_v10 = vld [vmem:[#allocation8 + $0x18] sm:$0xff]  ;;  %v507_v11 = vld [vmem:[#allocation8 + $0x10] sm:$0xff]  ;;  %s1809_s16 = smov 8   ;;  %s1810_s29 = smov 16   ;;  %vm1259_vm4 = vcmask 195584  }
  0x69   : > { %1444 = vmatprep.subr.mxu0 %v1804_v0  ;;  %1455 = vmatprep.subr.mxu1 %v1804_v0  ;;  %v506_v12 = vld [vmem:[#allocation8 + $0x8] sm:$0xff]  ;;  %v505_v13 = vld [vmem:[#allocation8] sm:$0xff]  ;;  %v1389_v14 = vld [vmem:[%s2132_s4] ss:$0 sm:$0xff]  ;;  %s1811_s21 = smov 24   ;;  %s1408_s1 = sshll.u32 %s1874_s28, 7 }
  0x6a   : > { %1445 = vmatpush3.msra.mxu0 %v341_v3  ;;  %1456 = vmatpush3.msra.mxu1 %v426_v4  ;;  %v1391_v15 = vld [vmem:[%s2133_s5] ss:$0 sm:$0xff]  ;;  %s337_s2 = scalar_lea.vmem [#allocation10], %s1384_s12  ;;  %s2090_s10 = scalar_lea.hbm %s2135_s7, %s1408_s1 }
  0x6b   : > { %1446 = vmatprep.subr.mxu0 %v1804_v0  ;;  %1457 = vmatprep.subr.mxu1 %v1804_v0  ;;  %v1393_v23 = vld [vmem:[%s2134_s6] ss:$0 sm:$0xff]  ;;  %s1276_s30 = sshll.u32 %s337_s2, 4  ;;  %p2157_p6 = scmp.ne.s32.totalorder %s2149_s20, 0  ;;  %s1277_s30 = int_to_ptr.vmem [resolvable:$true] %s1276_s30 }
  0x6c   : > { %1447 = vmatpush3.msra.mxu0 %v340_v5  ;;  %1458 = vmatpush3.msra.mxu1 %v425_v6  ;;  %s1812_s28 = smov [#allocation10]  }
  0x6d   : > { %1448 = vmatprep.subr.mxu0 %v1804_v0  ;;  %1459 = vmatprep.subr.mxu1 %v1804_v0  ;;  %s1728_s12 = sshll.u32 %s1812_s28, 4  ;;  %s1729_s12 = int_to_ptr.vmem [resolvable:$false] %s1728_s12 }
  0x6e   : > { %1449 = vmatpush3.msra.mxu0 %v339_v7  ;;  %1460 = vmatpush3.msra.mxu1 %v424_v8  ;;  %p1731_p5 = scmp.lt.s32.totalorder %s1277_s30, %s1729_s12 }
  0x6f   : > { %1451 = vmatmul.mubr.msk.f32.vlgmr.msra.gmra.mxu0 %vm350_vm1, %v338_v9  ;;  %1462 = vmatmul.mubr.msk.f32.vlgmr.msra.gmra.mxu1 %vm350_vm1, %v338_v9 }
  0x70   : > { %1475 = vmatprep.subr.mxu1 %v1804_v0  ;;  %1477 = vmatprep.mubr.msk.f32.mxu1 %vm1805_vm0, %v1804_v0 }
  0x71   : > { %1464 = vmatprep.subr.mxu0 %v1804_v0  ;;  %1472 = vmatprep.mubr.msk.f32.mxu0 %vm1805_vm0, %v1804_v0 }
  0x72   : > { %1465 = vmatpush3.msra.mxu0 %v508_v10 }
  0x73   : > { %1466 = vmatprep.subr.mxu0 %v1804_v0 }
  0x74   : > { %1467 = vmatpush3.msra.mxu0 %v507_v11 }
  0x75   : > { %1468 = vmatprep.subr.mxu0 %v1804_v0 }
  0x76   : > { %1469 = vmatpush3.msra.mxu0 %v506_v12 }
  0x77   : > { %1470 = vmatprep.subr.mxu0 %v1804_v0 }
  0x78   : > { %1471 = vmatpush3.msra.mxu0 %v505_v13 }
  0x79   : > { %1473 = vmatmul.mubr.msk.f32.vlgmr.msra.gmra.mxu0 %vm350_vm1, %v338_v9  ;;  %1485 = vmatprep.subr.mxu0 %v1804_v0 }
  0x7a   : > { %1487 = vmatprep.mubr.msk.f32.mxu0 %vm1805_vm0, %v1804_v0 }
 0x12f   : > { %v420_v16 = vpop.f32.mrf.mxu0  ;;  %v501_v17 = vpop.f32.mrf.mxu1 }
 0x130   : > { %v421_v18 = vadd.f32 %v1389_v14, %v420_v16  ;;  %v502_v19 = vadd.f32 %v1391_v15, %v501_v17 }
 0x131   : > { %v1452_v20 = vpop.f32.mrf.mxu0  ;;  %v1463_v21 = vpop.f32.mrf.mxu1 }
 0x132   : > { %v586_v22 = vmul.f32 0.35355338, %v421_v18  ;;  %916 = vrot.lane.b32.xlu1 %v502_v19, %s1806_s11  ;;  %750 = vrot.lane.b32.xlu0 %v502_v19, %s1807_s13 }
 0x133   : > { %1476 = vmatpush3.xpose.msk.msra.mxu1 %vm587_vm2, %v502_v19 }
 0x134   : > { %1480 = vmatprep.subr.mxu1 %v1804_v0 }
 0x136   : > { %1478 = vmatmul.mubr.msk.f32.vlgmr.msra.gmra.mxu1 %vm587_vm2, %v586_v22  ;;  %914 = vrot.lane.b32.xlu1 %v586_v22, %s1806_s11 }
 0x137   : > { %748 = vrot.lane.b32.xlu0 %v586_v22, %s1807_s13  ;;  %1482 = vmatprep.mubr.msk.f32.mxu1 %vm1805_vm0, %v1804_v0 }
 0x139   : > { %v582_v24 = vpop.f32.mrf.mxu0 }
 0x13a   : > { %1079 = vrot.lane.b32.xlu1 %v586_v22, %s1808_s22  ;;  %v583_v25 = vadd.f32 %v1393_v23, %v582_v24 }
 0x13b   : > { %1081 = vrot.lane.b32.xlu0 %v502_v19, %s1808_s22  ;;  %v1474_v26 = vpop.f32.mrf.mxu0 }
 0x13c   : > { %1481 = vmatpush3.msra.mxu1 %v583_v25 }
 0x13d   : > { %1490 = vmatprep.subr.mxu1 %v1804_v0 }
 0x1a4   : > { %v751_v27 = vpop.permute.xlu0 %750  ;;  %v917_v28 = vpop.permute.xlu1 %916 }
 0x1a5   : > { %1486 = vmatpush3.xpose.msk.msra.mxu0 %vm587_vm2, %v751_v27 }
 0x1a6   : > { %1495 = vmatprep.subr.mxu0 %v1804_v0 }
 0x1a8   : > { %v915_v30 = vpop.permute.xlu1 %914 }
 0x1a9   : > { %v749_v29 = vpop.permute.xlu0 %748 }
 0x1aa   : > { %1488 = vmatmul.mubr.msk.f32.vlgmr.msra.gmra.mxu0 %vm587_vm2, %v749_v29 }
 0x1ab   : > { %1496 = vmatpush3.xpose.msk.msra.mxu0 %vm587_vm2, %v917_v28  ;;  %1497 = vmatprep.mubr.msk.f32.mxu0 %vm1805_vm0, %v1804_v0 }
 0x1ac   : > { %1505 = vmatprep.subr.mxu0 %v1804_v0  ;;  %v1080_v32 = vpop.permute.xlu1 %1079 }
 0x1ad   : > { %v1082_v31 = vpop.permute.xlu0 %1081 }
 0x1ae   : > { %1498 = vmatmul.mubr.msk.f32.vlgmr.msra.gmra.mxu0 %vm587_vm2, %v915_v30 }
 0x1af   : > { %1506 = vmatpush3.xpose.msk.msra.mxu0 %vm587_vm2, %v1082_v31  ;;  %1507 = vmatprep.mubr.msk.f32.mxu0 %vm1805_vm0, %v1804_v0 }
 0x1b2   : > { %1508 = vmatmul.mubr.msk.f32.vlgmr.msra.gmra.mxu0 %vm587_vm2, %v1080_v32 }
 0x1f6   : > { %v660_v33 = vpop.f32.mrf.mxu1 }
 0x1f7   : > { %v664_v34 = vsel %vm587_vm2, %v660_v33, -inf }
 0x1f8   : > { %665 = vmax.xlane.f32.xlu0 %v664_v34  ;;  %v1479_v35 = vpop.f32.mrf.mxu1 }
 0x26a   : > { %v822_v36 = vpop.f32.mrf.mxu0 }
 0x26b   : > { %v826_v37 = vsel %vm587_vm2, %v822_v36, -inf }
 0x26c   : > { %827 = vmax.xlane.f32.xlu1 %v826_v37  ;;  %v1489_v38 = vpop.f32.mrf.mxu0 }
 0x26e   : > { %v988_v39 = vpop.f32.mrf.mxu0 }
 0x26f   : > { %v992_v40 = vsel %vm587_vm2, %v988_v39, -inf }
 0x270   : > { %993 = vmax.xlane.f32.xlu0 %v992_v40  ;;  %v1499_v41 = vpop.f32.mrf.mxu0 }
 0x272   : > { %v1153_v42 = vpop.f32.mrf.mxu0 }
 0x273   : > { %v1157_v43 = vsel %vm587_vm2, %v1153_v42, -inf }
 0x274   : > { %1158 = vmax.xlane.f32.xlu0 %v1157_v43  ;;  %v1509_v44 = vpop.f32.mrf.mxu0 }
 0x27d   : > { %836 = vrot.lane.b32.xlu1 %v583_v25, %s1807_s13  ;;  %s1724_s13 = scalar_lea.vmem %s1277_s30, 128 }
 0x27e   : > { %p1725_p4 = scmp.ne.s32.totalorder %s1277_s30, %s1724_s13 }
 0x280   : > { %p1726_p12 = pnand %p1725_p4, %p2157_p6 }
 0x281   : > { %v666_v45 = vpop.xlane.xlu0 %665  ;;  %1166 = vrot.lane.b32.xlu1 %v583_v25, %s1808_s22  ;;  %s1730_s22 = scalar_lea.vmem %s1729_s12, 256 }
 0x282   : > { %v667_v46 = vsub.f32 %v660_v33, %v666_v45  ;;  %p1727_p0 = pneg %p1726_p12  ;;  %p1732_p3 = scmp.lt.s32.totalorder %s1730_s22, %s1724_s13 }
 0x284   : > { %v668_v47 = vmul.f32 1.442695, %v667_v46  ;;  %p1733_p7 = por %p1732_p3, %p1731_p5 }
 0x286   : > { %1602 = vpow2.f32 %v668_v47  ;;  %p1734_p9 = pnand %p1733_p7, %p1727_p0 }
 0x28a   : > { %1001 = vrot.lane.b32.xlu0 %v583_v25, %s1806_s11  ;;  %s1263_s11 = scalar_lea.sflag [#allocation4], %s1979_s15 }
 0x293   : > { %v1603_v48 = vpop.eup %1602 }
 0x294   : > { %1483 = vmatmul.mubr.msk.f32.vlgmr.msra.gmra.mxu1 %vm587_vm2, %v1603_v48  ;;  %v670_v1 = vsel %vm587_vm2, %v1603_v48, 0.0 }
 0x295   : > { %1492 = vmatprep.mubr.msk.f32.mxu1 %vm1805_vm0, %v1804_v0 }
 0x2f5   : > { %v828_v49 = vpop.xlane.xlu1 %827 }
 0x2f6   : > { %v829_v50 = vsub.f32 %v822_v36, %v828_v49 }
 0x2f8   : > { %v830_v51 = vmul.f32 1.442695, %v829_v50 }
 0x2f9   : > { %v837_v52 = vpop.permute.xlu1 %836  ;;  %v994_v53 = vpop.xlane.xlu0 %993 }
 0x2fa   : > { %1604 = vpow2.f32 %v830_v51  ;;  %v995_v54 = vsub.f32 %v988_v39, %v994_v53  ;;  %1491 = vmatpush3.msra.mxu1 %v837_v52 }
 0x2fb   : > { %1500 = vmatprep.subr.mxu1 %v1804_v0 }
 0x2fc   : > { %v996_v55 = vmul.f32 1.442695, %v995_v54 }
 0x2fd   : > { %v1159_v56 = vpop.xlane.xlu0 %1158  ;;  %v1167_v63 = vpop.permute.xlu1 %1166 }
 0x2fe   : > { %1606 = vpow2.f32 %v996_v55  ;;  %v1160_v57 = vsub.f32 %v1153_v42, %v1159_v56 }
 0x300   : > { %v1161_v58 = vmul.f32 1.442695, %v1160_v57 }
 0x301   : > { %v1002_v60 = vpop.permute.xlu0 %1001 }
 0x302   : > { %1608 = vpow2.f32 %v1161_v58 }
 0x307   : > { %v1605_v59 = vpop.eup %1604 }
 0x308   : > { %1493 = vmatmul.mubr.msk.f32.vlgmr.msra.gmra.mxu1 %vm587_vm2, %v1605_v59  ;;  %v832_v61 = vsel %vm587_vm2, %v1605_v59, 0.0 }
 0x309   : > { %1501 = vmatpush3.msra.mxu1 %v1002_v60  ;;  %833 = vadd.xlane.f32.xlu1 %v832_v61 }
 0x30a   : > { %1502 = vmatprep.mubr.msk.f32.mxu1 %vm1805_vm0, %v1804_v0  ;;  %1510 = vmatprep.subr.mxu1 %v1804_v0 }
 0x30b   : > { %v1607_v62 = vpop.eup %1606 }
 0x30c   : > { %1503 = vmatmul.mubr.msk.f32.vlgmr.msra.gmra.mxu1 %vm587_vm2, %v1607_v62  ;;  %v998_v2 = vsel %vm587_vm2, %v1607_v62, 0.0 }
 0x30d   : > { %1511 = vmatpush3.msra.mxu1 %v1167_v63  ;;  %671 = vadd.xlane.f32.xlu1 %v670_v1 }
 0x30e   : > { %999 = vadd.xlane.f32.xlu0 %v998_v2  ;;  %1512 = vmatprep.mubr.msk.f32.mxu1 %vm1805_vm0, %v1804_v0 }
 0x30f   : > { %v1609_v3 = vpop.eup %1608 }
 0x310   : > { %1513 = vmatmul.mubr.msk.f32.vlgmr.msra.gmra.mxu1 %vm587_vm2, %v1609_v3  ;;  %v1163_v4 = vsel %vm587_vm2, %v1609_v3, 0.0 }
 0x312   : > { %1164 = vadd.xlane.f32.xlu0 %v1163_v4 }
 0x354   : > { %v742_v5 = vpop.f32.mrf.mxu1 }
 0x356   : > { %v1484_v6 = vpop.f32.mrf.mxu1 }
 0x392   : > { %v834_v7 = vpop.xlane.xlu1 %833 }
 0x393   : > { %1610 = vrcp.f32 %v834_v7 }
 0x396   : > { %v672_v21 = vpop.xlane.xlu1 %671 }
 0x397   : > { %v1000_v8 = vpop.xlane.xlu0 %999 }
 0x398   : > { %1612 = vrcp.f32 %v1000_v8 }
 0x39b   : > { %v1165_v9 = vpop.xlane.xlu0 %1164 }
 0x39c   : > { %1614 = vrcp.f32 %v1165_v9 }
 0x39d   : > { %1616 = vrcp.f32 %v672_v21 }
 0x3a0   : > { %v1611_v10 = vpop.eup %1610 }
 0x3a5   : > { %v1613_v0 = vpop.eup %1612 }
 0x3a9   : > { %v1615_v17 = vpop.eup %1614 }
 0x3aa   : > { %v1617_v22 = vpop.eup %1616 }
 0x3ab   : > { %v747_v25 = vmul.f32 %v1617_v22, %v742_v5 }
 0x3c8   : > { %v908_v11 = vpop.f32.mrf.mxu1 }
 0x3c9   : > { %v913_v12 = vmul.f32 %v1611_v10, %v908_v11 }
 0x3ca   : > { %v1494_v13 = vpop.f32.mrf.mxu1 }
 0x3cb   : > { %1245 = vrot.lane.b32.xlu0 %v913_v12, %s1809_s16 }
 0x3cc   : > { %v1073_v14 = vpop.f32.mrf.mxu1 }
 0x3cd   : > { %v1078_v15 = vmul.f32 %v1613_v0, %v1073_v14 }
 0x3ce   : > { %v1504_v16 = vpop.f32.mrf.mxu1 }
 0x3cf   : > { %1249 = vrot.lane.b32.xlu1 %v1078_v15, %s1810_s29 }
 0x3d0   : > { %v1238_v18 = vpop.f32.mrf.mxu1 }
 0x3d1   : > { %v1243_v19 = vmul.f32 %v1615_v17, %v1238_v18 }
 0x3d2   : > { %v1514_v20 = vpop.f32.mrf.mxu1 }
 0x3d3   : > { %1253 = vrot.lane.b32.xlu1 %v1243_v19, %s1811_s21 }
 0x43d   : > { %v1246_v23 = vpop.permute.xlu0 %1245 }
 0x43e   : > { %v1256_v26 = vsel %vm587_vm2, %v747_v25, %v1246_v23 }
 0x441   : > { %v1250_v24 = vpop.permute.xlu1 %1249 }
 0x442   : > { %v1258_v27 = vsel %vm1257_vm3, %v1256_v26, %v1250_v24 }
 0x445   : > { %v1254_v28 = vpop.permute.xlu1 %1253 }
 0x446   : > { %v1260_v29 = vsel %vm1259_vm4, %v1258_v27, %v1254_v28 }
 0x447   : > { %1261 = vst.msk [vmem:[%s337_s2] sm:$0xff] %vm350_vm1, %v1260_v29 }
 0x448   : > { %1737 = shalt.err (!%p1734_p9)
}
 0x449   : > { %s1738_s18 = scalar_lea.hbm %s2090_s10, 128  ;;  %s1742_s16 = scalar_lea.hbm %s2135_s7, 256 }
 0x44a   : > { %p1739_p13 = scmp.ne.s32.totalorder %s2090_s10, %s1738_s18  ;;  %p1743_p11 = scmp.lt.s32.totalorder %s2090_s10, %s2135_s7 }
 0x44b   : > { %p1744_p1 = scmp.lt.s32.totalorder %s1742_s16, %s1738_s18 }
 0x44c   : > { %p1740_p8 = pnand %p1739_p13, %p2157_p6 }
 0x44d   : > { %p1745_p2 = por %p1744_p1, %p1743_p11 }
 0x44e   : > { %p1741_p10 = pneg %p1740_p8 }
 0x450   : > { %p1746_p4 = pnand %p1745_p2, %p1741_p10 }
 0x452   : > { %1749 = shalt.err (!%p1746_p4)
}
 0x453   : > { %1529 = dma.vmem_to_hbm [thread:$0]  (%p2157_p6), %s1277_s30, 128, %s2090_s10, %s1263_s11  }
 0x454 PF: > { %s1288_s1 = sand.u32 1, %s1784_s24   ;;  %p2158_p12 = scmp.ne.s32.totalorder %s2143_s8, 0 }
 0x455   : > { %p2159_p0 = scmp.ge.s32.totalorder %s1796_s27, 2  ;;  %s1289_s2 = scalar_lea.sflag [#allocation4], %s1288_s1 }
 0x457   : > { %p1546_p5 = pnand %p2159_p0, %p2158_p12 }
 0x459   : > { %p1547_p3 = pneg %p1546_p5 }
 0x45b   : > { %1779 = dma.done.wait (%p1547_p3), %s1289_s2, 128  }
 0x45c   : > { %1781 = vsyncadd (%p1547_p3), %s1289_s2, 4294967168  ;;  %p22_p7 = scmp.ge.s32.totalorder %s1933_s14, 4   ;;  %s2160_s24 = smov %s1788_s25 }
 0x45d   : > { %s2161_s25 = smov %s1792_s26  ;;  %s2162_s26 = smov %s1943_s17 }
 0x45e   : > { %s2163_s27 = smov %s1933_s14  ;;  %24 = sbr.rel (!%p22_p7) target bundleno = 10 (0xa), region = 105 }
 0x463   :  { %1294 = vsyncpa [#allocation3], 1 }
 0x464   :  { %1296 = vsyncpa [#allocation3 + $0x1], 1 }
 0x465   :  { %1297 = vsyncpa [#allocation6], 1 }
 0x466   :  { %1298 = vsyncpa [#allocation9], 1 }
 0x467   :  { %1299 = vsyncpa [#allocation4], 1 }
 0x468   :  { %1301 = vsyncpa [#allocation4 + $0x1], 1 }

</bundles_post_ra>
